<compile_context>
chip_gen: v7x
topology: tpu7x:2x2x1
jax: 0.10.0
libtpu: 0.0.40
codegen_flags: <defaults>
</compile_context>

<pallas_src>
import functools

import jax
import jax.numpy as jnp
from jax import lax
from jax.experimental import pallas as pl
from jax.experimental.pallas import tpu as pltpu

LANES = 128              # vreg lane width
ACC_ROWS = 64            # accumulator rows -> 8 independent vreg add chains (32 KiB)
CHUNK_ROWS_MAX = 1024    # rows per inner compute chunk (keeps VMEM temporaries small)
MAX_BLOCK_ROWS = 8192    # 8192 * 128 * 4 B = 4 MiB per f32 input block
NUM_SHARDS_MAX = 2       # reduction split across TensorCores (v7x); harmless elsewhere
VMEM_LIMIT_BYTES = 32 * 1024 * 1024


def _round_up(x: int, m: int) -> int:
    return ((x + m - 1) // m) * m


def _mse_mean_kernel(x_ref, y_ref, o_ref, acc_ref, *, block_rows, chunk_rows,
                     total_rows, blocks_per_shard, inv_count, needs_mask):
    shard = pl.program_id(0)
    step = pl.program_id(1)

    # Zero the vector accumulator at the start of each shard's reduction.
    @pl.when(step == 0)
    def _():
        acc_ref[...] = jnp.zeros_like(acc_ref)

    # Logical (UNCLAMPED) block index of this grid step.  The index_map clamps
    # the DMA to a valid block, so any duplicated block past the end must be
    # masked here; using the logical row offset guarantees it contributes zero.
    logical_block = shard * blocks_per_shard + step
    block_row0 = logical_block * block_rows

    if needs_mask:
        # Hoisted chunk-local row ids (constant across the chunk loop).
        chunk_row_ids = lax.broadcasted_iota(jnp.int32, (chunk_rows, LANES), 0)

    n_chunks = block_rows // chunk_rows

    def chunk_body(c, carry):
        c0 = pl.multiple_of(c * chunk_rows, chunk_rows)
        x = x_ref[pl.ds(c0, chunk_rows), :]
        y = y_ref[pl.ds(c0, chunk_rows), :]
        # Difference in the native dtype (bf16 VALU on v6e/v7x, matches torch
        # MSELoss), square and accumulate in f32.
        d = (x - y).astype(jnp.float32)
        sq = d * d
        if needs_mask:
            # Rows at/past `total_rows` are DMA garbage (ragged final block or
            # a duplicated clamped block): zero them before accumulating.
            limit = total_rows - block_row0 - c0
            sq = jnp.where(chunk_row_ids < limit, sq, 0.0)
        # Partial reduce onto the (ACC_ROWS, 128) accumulator: pure VPU vreg
        # adds across 8 independent chains; no cross-lane (XLU) work per chunk.
        acc_ref[...] += jnp.sum(
            sq.reshape(chunk_rows // ACC_ROWS, ACC_ROWS, LANES), axis=0)
        return carry

    lax.fori_loop(0, n_chunks, chunk_body, None)

    # Per-shard epilogue: one cross-lane reduce + scale by 1/N (true count).
    @pl.when(step == pl.num_programs(1) - 1)
    def _():
        o_ref[...] = (jnp.sum(acc_ref[...]) * inv_count).reshape(1, 1, 1)


def criterion_parallel_mse(pred, target):
    """mean((pred - target)**2) computed in a Pallas TPU kernel."""
    assert pred.shape == target.shape, "criterion expects matching shapes"
    n_elems = pred.size
    assert n_elems > 0, "mean of an empty tensor is undefined"

    xf = pred.reshape(-1)
    yf = target.reshape(-1)

    rows = pl.cdiv(n_elems, LANES)
    padded = rows * LANES
    if padded != n_elems:
        # TODO(synk): non-128-aligned element counts still take one HBM pad copy
        # (pad amount <= 127 elements but XLA materializes the full padded
        # array).  The 128-aligned path below — the common case for NN tensors —
        # is fully zero-copy; a manual-DMA 1-D path would remove this too.
        xf = jnp.pad(xf, (0, padded - n_elems))
        yf = jnp.pad(yf, (0, padded - n_elems))
    xf = xf.reshape(rows, LANES)  # free reshape (bitcast) when already aligned
    yf = yf.reshape(rows, LANES)

    # Tiling: block rows are a multiple of the chunk size (and of ACC_ROWS /
    # the widest native sublane tile, 64 >= 32), capped at 8192 rows = 4 MiB f32.
    r64 = _round_up(rows, ACC_ROWS)
    if r64 <= CHUNK_ROWS_MAX:
        block_rows = r64
    else:
        block_rows = min(MAX_BLOCK_ROWS, _round_up(rows, CHUNK_ROWS_MAX))
    chunk_rows = min(CHUNK_ROWS_MAX, block_rows)

    num_blocks = pl.cdiv(rows, block_rows)
    num_shards = min(NUM_SHARDS_MAX, num_blocks)
    blocks_per_shard = pl.cdiv(num_blocks, num_shards)
    # Masking is needed whenever the sharded block grid over-covers the rows.
    needs_mask = (num_shards * blocks_per_shard * block_rows) != rows
    over_covered = num_shards * blocks_per_shard > num_blocks

    if over_covered:
        def in_map(i, j):
            # Clamp so the auto-pipelined DMA never addresses a block past the
            # array end; the duplicated block's data is fully masked in-kernel.
            return (jnp.minimum(i * blocks_per_shard + j, num_blocks - 1), 0)
    else:
        def in_map(i, j):
            return (i * blocks_per_shard + j, 0)

    kernel = functools.partial(
        _mse_mean_kernel,
        block_rows=block_rows,
        chunk_rows=chunk_rows,
        total_rows=rows,
        blocks_per_shard=blocks_per_shard,
        inv_count=1.0 / float(n_elems),
        needs_mask=needs_mask,
    )

    partials = pl.pallas_call(
        kernel,
        out_shape=jax.ShapeDtypeStruct((num_shards, 1, 1), jnp.float32),
        grid_spec=pltpu.PrefetchScalarGridSpec(
            num_scalar_prefetch=0,
            grid=(num_shards, blocks_per_shard),
            in_specs=[
                pl.BlockSpec((block_rows, LANES), in_map),
                pl.BlockSpec((block_rows, LANES), in_map),
            ],
            out_specs=pl.BlockSpec((1, 1, 1), lambda i, j: (i, 0, 0)),
            scratch_shapes=[pltpu.VMEM((ACC_ROWS, LANES), jnp.float32)],
        ),
        compiler_params=pltpu.CompilerParams(
            # Shard axis is independent (splits across TensorCores on
            # multi-core chips, e.g. v7x); block axis is the sequential
            # reduction carrying the accumulator.
            dimension_semantics=("parallel", "arbitrary"),
            vmem_limit_bytes=VMEM_LIMIT_BYTES,
        ),
    )(xf, yf)
    return jnp.sum(partials)


class CriterionParallel:
    """JAX/Pallas analogue of the PyTorch CriterionParallel module.

    The wrapped criterion is fixed to element-wise MSE; DataParallel replication
    is a no-op for the mathematical result (it only shards the batch before the
    trailing .mean()), so forward(*args) == criterion(*args).mean().
    """

    def __init__(self, criterion=None):
        # TODO(synk): arbitrary wrapped criteria are not supported; fixed to MSE.
        del criterion

    def __call__(self, pred, target):
        return criterion_parallel_mse(pred, target)


if __name__ == "__main__":
    key = jax.random.PRNGKey(0)
    k1, k2, k3, k4, k5, k6 = jax.random.split(key, 6)

    module = CriterionParallel()

    # Small NCHW-style criterion inputs (batch=2, channels=4, 16x16 spatial).
    x = jax.random.normal(k1, (2, 4, 16, 16), dtype=jnp.float32)
    t = jax.random.normal(k2, (2, 4, 16, 16), dtype=jnp.float32)
    loss = jax.block_until_ready(module(x, t))
    ref = jnp.mean((x - t) ** 2)
    assert jnp.allclose(loss, ref, rtol=1e-6, atol=1e-6), (loss, ref)

    # Non-128-aligned total element count (exercises the small-pad fallback).
    x2 = jax.random.normal(k3, (3, 5, 7, 9), dtype=jnp.float32)
    t2 = jax.random.normal(k4, (3, 5, 7, 9), dtype=jnp.float32)
    loss2 = jax.block_until_ready(module(x2, t2))
    ref2 = jnp.mean((x2 - t2) ** 2)
    assert jnp.allclose(loss2, ref2, rtol=1e-6, atol=1e-6), (loss2, ref2)

    # Multi-block, two-shard, ragged-final-block case (no padding, masked tail).
    x3 = jax.random.normal(k5, (5, 4, 256, 256), dtype=jnp.float32)
    t3 = jax.random.normal(k6, (5, 4, 256, 256), dtype=jnp.float32)
    loss3 = jax.block_until_ready(module(x3, t3))
    ref3 = jnp.mean((x3 - t3) ** 2)
    assert jnp.allclose(loss3, ref3, rtol=1e-5, atol=1e-6), (loss3, ref3)

    print("KERNEL_OK")
</pallas_src>

<mosaic_0001>
module attributes {stable_mosaic.version = 11 : i64} {
  func.func @_mse_mean_kernel(%arg0: i32, %arg1: i32, %arg2: memref<64x128xf32, #tpu.memory_space<vmem>>, %arg3: memref<64x128xf32, #tpu.memory_space<vmem>>, %arg4: memref<1x1x1xf32, #tpu.memory_space<vmem>>, %arg5: memref<64x128xf32, #tpu.memory_space<vmem>>) attributes {dimension_semantics = [#tpu.dimension_semantics<parallel>, #tpu.dimension_semantics<arbitrary>], iteration_bounds = array<i64: 1, 1>, scalar_prefetch = 0 : i64, scratch_operands = 1 : i64, tpu.core_type = #tpu.core_type<tc>, window_params = [{transform_indices = @transform_0, window_bounds = array<i64: 64, 128>}, {transform_indices = @transform_1, window_bounds = array<i64: 64, 128>}, {transform_indices = @transform_2, window_bounds = array<i64: 1, 1, 1>}]} {
    %c0_i32 = arith.constant 0 : i32
    %0 = arith.cmpi eq, %arg1, %c0_i32 : i32
    %1 = arith.extui %0 : i1 to i32
    %c0_i32_0 = arith.constant 0 : i32
    %2 = arith.cmpi ne, %1, %c0_i32_0 : i32
    scf.if %2 {
      %cst_12 = arith.constant 0.000000e+00 : f32
      %29 = vector.broadcast %cst_12 : f32 to vector<64x128xf32>
      %c0_13 = arith.constant 0 : index
      %c0_14 = arith.constant 0 : index
      %30 = vector.load %arg5[%c0_13, %c0_14] : memref<64x128xf32, #tpu.memory_space<vmem>>, vector<64x128xf32>
      tpu.vector_store %arg5[%c0_13, %c0_14], %29 {strides = array<i32>} : memref<64x128xf32, #tpu.memory_space<vmem>>, vector<64x128xf32>,
    } else {
    }
    %c1_i32 = arith.constant 1 : i32
    %3 = arith.muli %arg0, %c1_i32 : i32
    %4 = arith.addi %3, %arg1 : i32
    %c64_i32 = arith.constant 64 : i32
    %5 = arith.muli %4, %c64_i32 : i32
    %6 = tpu.iota {dimensions = array<i32: 0>} : vector<64x128xi32>
    %c0_i32_1 = arith.constant 0 : i32
    %c64_i32_2 = arith.constant 64 : i32
    %7 = arith.muli %c0_i32_1, %c64_i32_2 : i32
    %8 = tpu.assume_multiple %7, 64 : i32
    %9 = arith.index_cast %8 : i32 to index
    %c0 = arith.constant 0 : index
    %10 = vector.load %arg2[%9, %c0] : memref<64x128xf32, #tpu.memory_space<vmem>>, vector<64x128xf32>
    %11 = arith.index_cast %8 : i32 to index
    %c0_3 = arith.constant 0 : index
    %12 = vector.load %arg3[%11, %c0_3] : memref<64x128xf32, #tpu.memory_space<vmem>>, vector<64x128xf32>
    %13 = arith.subf %10, %12 : vector<64x128xf32>
    %14 = arith.mulf %13, %13 : vector<64x128xf32>
    %c16_i32 = arith.constant 16 : i32
    %15 = arith.subi %c16_i32, %5 : i32
    %16 = arith.subi %15, %8 : i32
    %17 = vector.broadcast %16 : i32 to vector<64x128xi32>
    %18 = arith.cmpi slt, %6, %17 : vector<64x128xi32>
    %cst = arith.constant 0.000000e+00 : f32
    %19 = vector.broadcast %cst : f32 to vector<64x128xf32>
    %20 = arith.select %18, %14, %19 : vector<64x128xi1>, vector<64x128xf32>
    %c0_4 = arith.constant 0 : index
    %c0_5 = arith.constant 0 : index
    %21 = vector.load %arg5[%c0_4, %c0_5] : memref<64x128xf32, #tpu.memory_space<vmem>>, vector<64x128xf32>
    %22 = vector.shape_cast %20 : vector<64x128xf32> to vector<1x64x128xf32>
    %cst_6 = arith.constant dense<0.000000e+00> : vector<64x128xf32>
    %23 = vector.multi_reduction <add>, %22, %cst_6 [0] : vector<1x64x128xf32> to vector<64x128xf32>
    %24 = arith.addf %21, %23 : vector<64x128xf32>
    %c0_7 = arith.constant 0 : index
    %c0_8 = arith.constant 0 : index
    %25 = vector.load %arg5[%c0_7, %c0_8] : memref<64x128xf32, #tpu.memory_space<vmem>>, vector<64x128xf32>
    tpu.vector_store %arg5[%c0_7, %c0_8], %24 {strides = array<i32>} : memref<64x128xf32, #tpu.memory_space<vmem>>, vector<64x128xf32>,
    %c1_i32_9 = arith.constant 1 : i32
    %c0_i32_10 = arith.constant 0 : i32
    %26 = arith.cmpi eq, %arg1, %c0_i32_10 : i32
    %27 = arith.extui %26 : i1 to i32
    %c0_i32_11 = arith.constant 0 : i32
    %28 = arith.cmpi ne, %27, %c0_i32_11 : i32
    scf.if %28 {
      %c0_12 = arith.constant 0 : index
      %c0_13 = arith.constant 0 : index
      %29 = vector.load %arg5[%c0_12, %c0_13] : memref<64x128xf32, #tpu.memory_space<vmem>>, vector<64x128xf32>
      %30 = vector.shape_cast %29 : vector<64x128xf32> to vector<1x64x128xf32>
      %cst_14 = arith.constant dense<0.000000e+00> : vector<1xf32>
      %31 = vector.multi_reduction <add>, %30, %cst_14 [1, 2] : vector<1x64x128xf32> to vector<1xf32>
      %32 = vector.shape_cast %31 : vector<1xf32> to vector<1x1x1xf32>
      %33 = vector.extract %32[0, 0, 0] : f32 from vector<1x1x1xf32>
      %cst_15 = arith.constant 4.8828125E-4 : f32
      %34 = arith.mulf %33, %cst_15 : f32
      %35 = vector.broadcast %34 : f32 to vector<1x1x1xf32>
      %c0_16 = arith.constant 0 : index
      %c0_17 = arith.constant 0 : index
      %c0_18 = arith.constant 0 : index
      %36 = vector.load %arg4[%c0_16, %c0_17, %c0_18] : memref<1x1x1xf32, #tpu.memory_space<vmem>>, vector<1x1x1xf32>
      tpu.vector_store %arg4[%c0_16, %c0_17, %c0_18], %35 {strides = array<i32>} : memref<1x1x1xf32, #tpu.memory_space<vmem>>, vector<1x1x1xf32>,
    } else {
    }
    return
  }
  func.func @transform_0(%arg0: i32, %arg1: i32) -> (i32, i32) {
    %c1_i32 = arith.constant 1 : i32
    %0 = arith.muli %arg0, %c1_i32 : i32
    %1 = arith.addi %0, %arg1 : i32
    %c0_i32 = arith.constant 0 : i32
    %c0_i32_0 = arith.constant 0 : i32
    return %1, %c0_i32 : i32, i32
  }
  func.func @transform_1(%arg0: i32, %arg1: i32) -> (i32, i32) {
    %c1_i32 = arith.constant 1 : i32
    %0 = arith.muli %arg0, %c1_i32 : i32
    %1 = arith.addi %0, %arg1 : i32
    %c0_i32 = arith.constant 0 : i32
    %c0_i32_0 = arith.constant 0 : i32
    return %1, %c0_i32 : i32, i32
  }
  func.func @transform_2(%arg0: i32, %arg1: i32) -> (i32, i32, i32) {
    %c0_i32 = arith.constant 0 : i32
    %c0_i32_0 = arith.constant 0 : i32
    %c0_i32_1 = arith.constant 0 : i32
    return %arg0, %c0_i32, %c0_i32_0 : i32, i32, i32
  }
}

</mosaic_0001>

<bundles_post_ra>
// kernel: tpu_custom_call.1
= control target key start
LH: loop header
LB: loop body
LE: loop exit
PB: predicated region body
PF: predicated region fallthrough
CT: control target
= control target key end

     0   :  { %7 = vsyncpa [#allocation4], 0  ;;  %s352_s0 = inlined_call_operand.hbm [shape: f32[16,128], index: 0, kind: input, shape index: {}]   ;;  %s353_s1 = inlined_call_operand.hbm [shape: f32[16,128], index: 1, kind: input, shape index: {}]   ;;  %s354_s2 = inlined_call_operand.hbm [shape: f32[1,1,1], index: 2, kind: output, shape index: {}]  }
   0x1   :  { %8 = vsyncpa [#allocation7], 0 }
   0x2   :  { %9 = vsyncpa [#allocation5], 0 }
   0x3   :  { %18 = vsyncadd [#allocation4], 768  ;;  %s296_s9 = smov [#allocation3]   ;;  %s224_s13 = scalar_lea.hbm %s352_s0, 256 }
   0x4   :  { %s23_s10 = sshll.u32 %s296_s9, 4  ;;  %p225_p0 = scmp.ne.s32.totalorder %s352_s0, %s224_s13  ;;  %s24_s10 = int_to_ptr.vmem [resolvable:$true] %s23_s10 }
   0x5   :  { %p228_p1 = scmp.lt.u32.totalorder %s224_s13, %s352_s0 }
   0x7   :  { %p230_p2 = pnand %p228_p1, %p225_p0 }
   0x9   :  { %233 = shalt.err (!%p230_p2)
}
   0xa   :  { %s234_s18 = scalar_lea.vmem %s24_s10, 256  ;;  %s238_s19 = scalar_lea.vmem %s24_s10, 1024 }
   0xb   :  { %p235_p3 = scmp.ne.s32.totalorder %s24_s10, %s234_s18  ;;  %p239_p4 = scmp.lt.s32.totalorder %s24_s10, %s24_s10 }
   0xc   :  { %p240_p5 = scmp.lt.s32.totalorder %s238_s19, %s234_s18 }
   0xe   :  { %p241_p6 = por %p240_p5, %p239_p4 }
  0x10   :  { %p242_p7 = pnand %p241_p6, %p235_p3 }
  0x12   :  { %245 = shalt.err (!%p242_p7)
}
  0x13   :  { %s297_s20 = smov 128   ;;  %s298_s21 = smov 8  }
  0x14   :  { %29 = dma.hbm_to_vmem [thread:$0]  %s352_s0, 256, %s24_s10, [#allocation4], %s297_s20, %s297_s20, %s298_s21  }
  0x15   :  { %38 = vsyncadd [#allocation7], 768  ;;  %s299_s24 = smov [#allocation6]   ;;  %s246_s28 = scalar_lea.hbm %s353_s1, 256 }
  0x16   :  { %s43_s25 = sshll.u32 %s299_s24, 4  ;;  %p247_p8 = scmp.ne.s32.totalorder %s353_s1, %s246_s28  ;;  %s44_s25 = int_to_ptr.vmem [resolvable:$true] %s43_s25 }
  0x17   :  { %p250_p9 = scmp.lt.u32.totalorder %s246_s28, %s353_s1 }
  0x19   :  { %p252_p10 = pnand %p250_p9, %p247_p8 }
  0x1b   :  { %255 = shalt.err (!%p252_p10)
}
  0x1c   :  { %s256_s5 = scalar_lea.vmem %s44_s25, 256  ;;  %s260_s0 = scalar_lea.vmem %s44_s25, 1024 }
  0x1d   :  { %p257_p11 = scmp.ne.s32.totalorder %s44_s25, %s256_s5  ;;  %p261_p12 = scmp.lt.s32.totalorder %s44_s25, %s44_s25 }
  0x1e   :  { %p262_p13 = scmp.lt.s32.totalorder %s260_s0, %s256_s5 }
  0x20   :  { %p263_p0 = por %p262_p13, %p261_p12 }
  0x22   :  { %p264_p1 = pnand %p263_p0, %p257_p11 }
  0x24   :  { %267 = shalt.err (!%p264_p1)
}
  0x25   :  { %49 = dma.hbm_to_vmem [thread:$0]  %s353_s1, 256, %s44_s25, [#allocation7], %s297_s20, %s297_s20, %s298_s21  }
  0x26   :  { %290 = dma.done.wait [#allocation4], 1024  }
  0x27   :  { %291 = vsyncadd [#allocation4], 4294966272 }
  0x28   :  { %292 = dma.done.wait [#allocation7], 1024  }
  0x29   :  { %293 = vsyncadd [#allocation7], 4294966272  ;;  %v87_v0 = vld [vmem:[#allocation3] sm:$0xff]  ;;  %v88_v1 = vld [vmem:[#allocation3 + $0x8] sm:$0xff]  ;;  %s300_s1 = smov [#allocation8]   ;;  %vm199_vm0 = vcmask 0  }
  0x2a   :  { %v95_v2 = vld [vmem:[#allocation6] sm:$0xff]  ;;  %v96_v3 = vld [vmem:[#allocation6 + $0x8] sm:$0xff]  ;;  %s207_s8 = sshll.u32 %s300_s1, 4  ;;  %s208_s8 = int_to_ptr.vmem [resolvable:$true] %s207_s8 }
  0x2b   :  { %v103_v4 = vsub.f32 %v87_v0, %v95_v2  ;;  %v104_v5 = vsub.f32 %v88_v1, %v96_v3  ;;  %s268_s11 = scalar_lea.vmem %s208_s8, 16  ;;  %s272_s12 = scalar_lea.vmem %s208_s8, 32 }
  0x2c   :  { %p269_p2 = scmp.ne.s32.totalorder %s208_s8, %s268_s11  ;;  %p273_p3 = scmp.lt.s32.totalorder %s208_s8, %s208_s8 }
  0x2d   :  { %v111_v6 = vmul.f32 %v103_v4, %v103_v4  ;;  %v112_v7 = vmul.f32 %v104_v5, %v104_v5  ;;  %p274_p4 = scmp.lt.s32.totalorder %s272_s12, %s268_s11 }
  0x2f   :  { %v181_v8 = vadd.f32 %v112_v7, %v111_v6  ;;  %p275_p5 = por %p274_p4, %p273_p3 }
  0x31   :  { %188 = vadd.xlane.f32.xlu0 %v181_v8  ;;  %p276_p6 = pnand %p275_p5, %p269_p2 }
  0xbe   :  { %v189_v9 = vpop.xlane.xlu0 %188 }
  0xbf   :  { %v190_v10 = vrot.slane %v189_v9, 4 }
  0xc1   :  { %v191_v11 = vadd.f32 %v190_v10, %v189_v9 }
  0xc3   :  { %v192_v12 = vrot.slane %v191_v11, 2 }
  0xc5   :  { %v193_v13 = vadd.f32 %v192_v12, %v191_v11 }
  0xc7   :  { %v194_v14 = vrot.slane %v193_v13, 1 }
  0xc9   :  { %v195_v15 = vadd.f32 %v194_v14, %v193_v13 }
  0xcb   :  { %217 = vpush %v195_v15 }
  0xfc   :  { %s218_s9 = spop %217 }
  0xfd   :  { %s197_s10 = smul.f32 0.00048828125, %s218_s9 }
  0xff   :  { %v198_v16 = vstv %s197_s10 }
 0x100   :  { %200 = vst.msk [vmem:[#allocation8] sm:$0x1] %vm199_vm0, %v198_v16 }
 0x101   :  { %279 = shalt.err (!%p276_p6)
}
 0x102   :  { %s280_s15 = scalar_lea.hbm %s354_s2, 16 }
 0x103   :  { %p281_p7 = scmp.ne.s32.totalorder %s354_s2, %s280_s15  ;;  %p284_p8 = scmp.lt.u32.totalorder %s280_s15, %s354_s2 }
 0x105   :  { %p286_p9 = pnand %p284_p8, %p281_p7 }
 0x107   :  { %289 = shalt.err (!%p286_p9)
}
 0x108   :  { %210 = dma.vmem_to_hbm [thread:$0]  %s208_s8, 16, %s354_s2, [#allocation5]  }
 0x109   :  { %294 = dma.done.wait [#allocation5], 16  }
 0x10a   :  { %295 = vsyncadd [#allocation5], 4294967280 }
 0x10b   :  { %214 = vsyncpa [#allocation4], 1 }
 0x10c   :  { %215 = vsyncpa [#allocation7], 1 }
 0x10d   :  { %216 = vsyncpa [#allocation5], 1 }

</bundles_post_ra>
